<compile_context>
chip_gen: v6e
topology: v6e:2x2x1
jax: 0.10.0
libtpu: 0.0.40
codegen_flags: <defaults>
</compile_context>

<pallas_src>
import math
from functools import partial

import jax
import jax.numpy as jnp
from jax import lax
from jax.experimental import pallas as pl
from jax.experimental.pallas import tpu as pltpu

_LANES = 128
_SUBLANES = 8
_CHUNK_ROWS = 64            # rows per inner loop step: 8 input vregs (32 KiB)
_TWO_PI = 2.0 * math.pi


def _round_up(a, b):
    return ((a + b - 1) // b) * b


def _fold_rows(v, chunk):
    """Sum a (chunk, 128) value down to (8, 128) by whole-vreg adds (pure VPU)."""
    acc = v[0:_SUBLANES, :]
    for j in range(1, chunk // _SUBLANES):
        acc = acc + v[j * _SUBLANES:(j + 1) * _SUBLANES, :]
    return acc


def _ackley_partials_kernel(x_ref, osq_ref, ocos_ref, acc_sq, acc_cos, *,
                            bounds, d, tile_r, chunk, bpc):
    c = pl.program_id(0)          # TensorCore split ("parallel")
    k = pl.program_id(1)          # reduction over row blocks ("arbitrary")
    nk = pl.num_programs(1)

    @pl.when(k == 0)
    def _init():
        acc_sq[...] = jnp.zeros_like(acc_sq)
        acc_cos[...] = jnp.zeros_like(acc_cos)

    blk = c * bpc + k                       # logical block id (may be a clamped phantom)
    base = blk * (tile_r * _LANES)          # global element index of the block start
    n_chunks = tile_r // chunk

    def _wrap_and_eval(xc):
        if bounds is not None:
            b = jnp.float32(bounds)
            # round-half-away-from-zero(x/b); |x|/b + floor is bit-identical to the
            # reference's floor(x/b+0.5) / ceil(x/b-0.5) pair.
            n = jnp.floor(jnp.abs(xc) / b + 0.5)
            xc = xc - b * jnp.where(xc >= 0, n, -n)
        return xc * xc, jnp.cos(jnp.float32(_TWO_PI) * xc)

    # Fast path: every element of this block is valid -> no masking ops at all.
    is_full = (base + tile_r * _LANES) <= d

    @pl.when(is_full)
    def _full_block():
        def body(i, carry):
            off = pl.multiple_of(i * chunk, chunk)
            sq, cs = _wrap_and_eval(x_ref[pl.ds(off, chunk), :])
            acc_sq[...] += _fold_rows(sq, chunk)
            acc_cos[...] += _fold_rows(cs, chunk)
            return carry
        lax.fori_loop(0, n_chunks, body, 0)

    # Slow path (taken only for the last / phantom block): mask elements >= d so
    # padded lanes and OOB rows contribute exactly zero to both sums.
    @pl.when(jnp.logical_not(is_full))
    def _ragged_block():
        idx0 = (lax.broadcasted_iota(jnp.int32, (chunk, _LANES), 0) * _LANES
                + lax.broadcasted_iota(jnp.int32, (chunk, _LANES), 1))

        def body(i, carry):
            off = pl.multiple_of(i * chunk, chunk)
            sq, cs = _wrap_and_eval(x_ref[pl.ds(off, chunk), :])
            mask = (base + off * _LANES + idx0) < d
            acc_sq[...] += _fold_rows(jnp.where(mask, sq, 0.0), chunk)
            acc_cos[...] += _fold_rows(jnp.where(mask, cs, 0.0), chunk)
            return carry
        lax.fori_loop(0, n_chunks, body, 0)

    @pl.when(k == nk - 1)
    def _finalize():
        # Lane-dense per-core partials; final reduce + sqrt/exp done in the wrapper.
        osq_ref[...] = acc_sq[...]
        ocos_ref[...] = acc_cos[...]


def ackley_sums_pallas(x, bounds=None, tile_rows=2048):
    """Returns (sum(x_wrapped**2), sum(cos(2*pi*x_wrapped))) as f32 scalars."""
    x = jnp.asarray(x, jnp.float32).reshape(-1)
    d = int(x.shape[0])

    rows = -(-d // _LANES)                      # lane-rows needed to hold d elements
    rows8 = _round_up(rows, _SUBLANES)

    if rows8 <= _CHUNK_ROWS:
        # Tiny input: one block that exactly covers the (slightly zero-padded) slab.
        tile_r = chunk = rows8
        arr_rows = rows8
    else:
        tile_r = max(_CHUNK_ROWS,
                     (min(int(tile_rows), rows) // _CHUNK_ROWS) * _CHUNK_ROWS)
        chunk = _CHUNK_ROWS
        arr_rows = rows                         # no whole-array repack for big inputs

    pad = arr_rows * _LANES - d
    if pad:
        # Only needed when d is not a multiple of 128 (or for tiny inputs); the padded
        # slots are additionally masked in-kernel, so their values never contribute.
        x = jnp.pad(x, (0, pad))
    x2d = x.reshape(arr_rows, _LANES)           # sublane+lane dense layout

    total_blocks = -(-arr_rows // tile_r)
    n_split = 2 if total_blocks >= 2 else 1     # use both TensorCores on dual-TC chips
    bpc = -(-total_blocks // n_split)           # row blocks per core
    last_blk = total_blocks - 1

    kernel = partial(_ackley_partials_kernel, bounds=bounds, d=d,
                     tile_r=tile_r, chunk=chunk, bpc=bpc)

    psq, pcos = pl.pallas_call(
        kernel,
        out_shape=(jax.ShapeDtypeStruct((n_split, _SUBLANES, _LANES), jnp.float32),
                   jax.ShapeDtypeStruct((n_split, _SUBLANES, _LANES), jnp.float32)),
        grid_spec=pltpu.PrefetchScalarGridSpec(
            num_scalar_prefetch=0,
            grid=(n_split, bpc),
            in_specs=[pl.BlockSpec(
                (tile_r, _LANES),
                # Clamp phantom blocks of the second core onto the last real block;
                # their contributions are fully masked in-kernel.
                lambda c, k: (jnp.minimum(c * bpc + k, last_blk), 0))],
            out_specs=[pl.BlockSpec((None, _SUBLANES, _LANES), lambda c, k: (c, 0, 0)),
                       pl.BlockSpec((None, _SUBLANES, _LANES), lambda c, k: (c, 0, 0))],
            scratch_shapes=[pltpu.VMEM((_SUBLANES, _LANES), jnp.float32),
                            pltpu.VMEM((_SUBLANES, _LANES), jnp.float32)],
        ),
        compiler_params=pltpu.CompilerParams(
            dimension_semantics=("parallel", "arbitrary"),
            vmem_limit_bytes=32 * 1024 * 1024,   # safe on v5e/v6e/v7x for these tiles
        ),
    )(x2d)

    return jnp.sum(psq), jnp.sum(pcos)


def ackley_pallas(x, bounds=None, tile_rows=2048):
    """Ackley objective of a 1-D vector via the Pallas kernel. Returns scalar f32."""
    sum_sq, sum_cos = ackley_sums_pallas(x, bounds=bounds, tile_rows=tile_rows)
    return (-20.0 * jnp.exp(-0.2 * jnp.sqrt(0.5 * sum_sq))
            - jnp.exp(0.5 * sum_cos)
            + 20.0 + jnp.float32(math.e))


class Ackley:
    """Mirror of the PyTorch Ackley nn.Module: holds 'weights' and optional bounds."""

    def __init__(self, start, bounds=None):
        self.weights = jnp.asarray(start, dtype=jnp.float32)
        self.bounds = bounds

    def forward(self, X=None):
        if X is None:
            X = self.weights
        return ackley_pallas(X, bounds=self.bounds)


# ----------------------------- pure-JAX reference -----------------------------

def _ackley_wrap_ref(x, bounds):
    b = jnp.float32(bounds)
    pos = x - b * jnp.floor(x / b + 0.5)
    neg = x - b * jnp.ceil(x / b - 0.5)
    return jnp.where(x >= 0, pos, neg)


def _ackley_ref(x, bounds=None):
    x = jnp.asarray(x, jnp.float32)
    if bounds is not None:
        x = _ackley_wrap_ref(x, bounds)
    return (-20.0 * jnp.exp(-0.2 * jnp.sqrt(0.5 * jnp.sum(x * x)))
            - jnp.exp(0.5 * jnp.sum(jnp.cos(2.0 * math.pi * x)))
            + 20.0 + math.e)


if __name__ == "__main__":
    key = jax.random.PRNGKey(0)
    k1, k2, k3 = jax.random.split(key, 3)

    # Case 1: D=128, no bounds, X=None (module weights). Single tiny block (masked path).
    start = jax.random.normal(k1, (128,), dtype=jnp.float32) * 3.0
    mod = Ackley(start, bounds=None)
    z1 = jax.block_until_ready(mod.forward())
    ref1 = _ackley_ref(start)
    assert jnp.allclose(z1, ref1, rtol=1e-3, atol=1e-3), (z1, ref1)

    # Case 2: D=2000 (not a multiple of 128 -> ragged tail masked in-kernel), periodic
    # bounds, default tile size.
    x2 = jax.random.normal(k2, (2000,), dtype=jnp.float32) * 7.0
    modb = Ackley(start, bounds=4.0)
    z2 = jax.block_until_ready(modb.forward(x2))
    ref2 = _ackley_ref(x2, bounds=4.0)
    assert jnp.allclose(z2, ref2, rtol=1e-3, atol=1e-3), (z2, ref2)

    # Case 3: D=20480 with tile_rows=64 -> 3 row blocks split over the 2-way "parallel"
    # axis: exercises multi-step accumulation, the ragged last block and the clamped
    # (fully masked) phantom block on the second core.  Compare the raw sums tightly.
    x3 = jax.random.normal(k3, (20480,), dtype=jnp.float32) * 7.0
    ssq, scos = jax.block_until_ready(ackley_sums_pallas(x3, bounds=4.0, tile_rows=64))
    x3w = _ackley_wrap_ref(x3, 4.0)
    ref_ssq = jnp.sum(x3w * x3w)
    ref_scos = jnp.sum(jnp.cos(2.0 * math.pi * x3w))
    assert jnp.allclose(ssq, ref_ssq, rtol=1e-3, atol=1e-2), (ssq, ref_ssq)
    assert jnp.allclose(scos, ref_scos, rtol=1e-3, atol=1e-1), (scos, ref_scos)
    # z itself passes sum_cos through exp(0.5*.), which amplifies f32 summation-order
    # differences for large D, so compare the final value with a looser tolerance.
    z3 = jax.block_until_ready(ackley_pallas(x3, bounds=4.0, tile_rows=64))
    ref3 = _ackley_ref(x3, bounds=4.0)
    assert jnp.allclose(z3, ref3, rtol=5e-2, atol=1e-3), (z3, ref3)

    print("KERNEL_OK")
</pallas_src>

<mosaic_0001>
module attributes {stable_mosaic.version = 11 : i64} {
  func.func @_ackley_partials_kernel(%arg0: i32, %arg1: i32, %arg2: memref<8x128xf32, #tpu.memory_space<vmem>>, %arg3: memref<1x8x128xf32, #tpu.memory_space<vmem>>, %arg4: memref<1x8x128xf32, #tpu.memory_space<vmem>>, %arg5: memref<8x128xf32, #tpu.memory_space<vmem>>, %arg6: memref<8x128xf32, #tpu.memory_space<vmem>>) attributes {dimension_semantics = [#tpu.dimension_semantics<parallel>, #tpu.dimension_semantics<arbitrary>], iteration_bounds = array<i64: 1, 1>, scalar_prefetch = 0 : i64, scratch_operands = 2 : i64, tpu.core_type = #tpu.core_type<tc>, window_params = [{transform_indices = @transform_0, window_bounds = array<i64: 8, 128>}, {transform_indices = @transform_1, window_bounds = array<i64: 1, 8, 128>}, {transform_indices = @transform_2, window_bounds = array<i64: 1, 8, 128>}]} {
    %c0_i32 = arith.constant 0 : i32
    %0 = arith.cmpi eq, %arg1, %c0_i32 : i32
    %1 = arith.extui %0 : i1 to i32
    %c0_i32_0 = arith.constant 0 : i32
    %2 = arith.cmpi ne, %1, %c0_i32_0 : i32
    scf.if %2 {
      %cst = arith.constant 0.000000e+00 : f32
      %16 = vector.broadcast %cst : f32 to vector<8x128xf32>
      %c0 = arith.constant 0 : index
      %c0_6 = arith.constant 0 : index
      %17 = vector.load %arg5[%c0, %c0_6] : memref<8x128xf32, #tpu.memory_space<vmem>>, vector<8x128xf32>
      tpu.vector_store %arg5[%c0, %c0_6], %16 {strides = array<i32>} : memref<8x128xf32, #tpu.memory_space<vmem>>, vector<8x128xf32>,
      %cst_7 = arith.constant 0.000000e+00 : f32
      %18 = vector.broadcast %cst_7 : f32 to vector<8x128xf32>
      %c0_8 = arith.constant 0 : index
      %c0_9 = arith.constant 0 : index
      %19 = vector.load %arg6[%c0_8, %c0_9] : memref<8x128xf32, #tpu.memory_space<vmem>>, vector<8x128xf32>
      tpu.vector_store %arg6[%c0_8, %c0_9], %18 {strides = array<i32>} : memref<8x128xf32, #tpu.memory_space<vmem>>, vector<8x128xf32>,
    } else {
    }
    %c1_i32 = arith.constant 1 : i32
    %3 = arith.muli %arg0, %c1_i32 : i32
    %4 = arith.addi %3, %arg1 : i32
    %c1024_i32 = arith.constant 1024 : i32
    %5 = arith.muli %4, %c1024_i32 : i32
    %c1024_i32_1 = arith.constant 1024 : i32
    %6 = arith.addi %5, %c1024_i32_1 : i32
    %c128_i32 = arith.constant 128 : i32
    %7 = arith.cmpi sle, %6, %c128_i32 : i32
    %8 = arith.extui %7 : i1 to i32
    %c0_i32_2 = arith.constant 0 : i32
    %9 = arith.cmpi ne, %8, %c0_i32_2 : i32
    scf.if %9 {
      %c0_i32_6 = arith.constant 0 : i32
      %c8_i32 = arith.constant 8 : i32
      %16 = arith.muli %c0_i32_6, %c8_i32 : i32
      %17 = tpu.assume_multiple %16, 8 : i32
      %18 = arith.index_cast %17 : i32 to index
      %c0 = arith.constant 0 : index
      %19 = vector.load %arg2[%18, %c0] : memref<8x128xf32, #tpu.memory_space<vmem>>, vector<8x128xf32>
      %20 = arith.mulf %19, %19 : vector<8x128xf32>
      %cst = arith.constant 6.28318548 : f32
      %21 = vector.broadcast %cst : f32 to vector<8x128xf32>
      %22 = arith.mulf %21, %19 : vector<8x128xf32>
      %23 = math.cos %22 : vector<8x128xf32>
      %c0_7 = arith.constant 0 : index
      %c0_8 = arith.constant 0 : index
      %24 = vector.load %arg5[%c0_7, %c0_8] : memref<8x128xf32, #tpu.memory_space<vmem>>, vector<8x128xf32>
      %25 = arith.addf %24, %20 : vector<8x128xf32>
      %c0_9 = arith.constant 0 : index
      %c0_10 = arith.constant 0 : index
      %26 = vector.load %arg5[%c0_9, %c0_10] : memref<8x128xf32, #tpu.memory_space<vmem>>, vector<8x128xf32>
      tpu.vector_store %arg5[%c0_9, %c0_10], %25 {strides = array<i32>} : memref<8x128xf32, #tpu.memory_space<vmem>>, vector<8x128xf32>,
      %c0_11 = arith.constant 0 : index
      %c0_12 = arith.constant 0 : index
      %27 = vector.load %arg6[%c0_11, %c0_12] : memref<8x128xf32, #tpu.memory_space<vmem>>, vector<8x128xf32>
      %28 = arith.addf %27, %23 : vector<8x128xf32>
      %c0_13 = arith.constant 0 : index
      %c0_14 = arith.constant 0 : index
      %29 = vector.load %arg6[%c0_13, %c0_14] : memref<8x128xf32, #tpu.memory_space<vmem>>, vector<8x128xf32>
      tpu.vector_store %arg6[%c0_13, %c0_14], %28 {strides = array<i32>} : memref<8x128xf32, #tpu.memory_space<vmem>>, vector<8x128xf32>,
      %c1_i32_15 = arith.constant 1 : i32
    } else {
    }
    %true = arith.constant true
    %10 = arith.xori %7, %true : i1
    %11 = arith.extui %10 : i1 to i32
    %c0_i32_3 = arith.constant 0 : i32
    %12 = arith.cmpi ne, %11, %c0_i32_3 : i32
    scf.if %12 {
      %16 = tpu.iota {dimensions = array<i32: 0>} : vector<8x128xi32>
      %c128_i32_6 = arith.constant 128 : i32
      %17 = vector.broadcast %c128_i32_6 : i32 to vector<8x128xi32>
      %18 = arith.muli %16, %17 : vector<8x128xi32>
      %19 = tpu.iota {dimensions = array<i32: 1>} : vector<8x128xi32>
      %20 = arith.addi %18, %19 : vector<8x128xi32>
      %c0_i32_7 = arith.constant 0 : i32
      %c8_i32 = arith.constant 8 : i32
      %21 = arith.muli %c0_i32_7, %c8_i32 : i32
      %22 = tpu.assume_multiple %21, 8 : i32
      %23 = arith.index_cast %22 : i32 to index
      %c0 = arith.constant 0 : index
      %24 = vector.load %arg2[%23, %c0] : memref<8x128xf32, #tpu.memory_space<vmem>>, vector<8x128xf32>
      %25 = arith.mulf %24, %24 : vector<8x128xf32>
      %cst = arith.constant 6.28318548 : f32
      %26 = vector.broadcast %cst : f32 to vector<8x128xf32>
      %27 = arith.mulf %26, %24 : vector<8x128xf32>
      %28 = math.cos %27 : vector<8x128xf32>
      %c128_i32_8 = arith.constant 128 : i32
      %29 = arith.muli %22, %c128_i32_8 : i32
      %30 = arith.addi %5, %29 : i32
      %31 = vector.broadcast %30 : i32 to vector<8x128xi32>
      %32 = arith.addi %31, %20 : vector<8x128xi32>
      %c128_i32_9 = arith.constant 128 : i32
      %33 = vector.broadcast %c128_i32_9 : i32 to vector<8x128xi32>
      %34 = arith.cmpi slt, %32, %33 : vector<8x128xi32>
      %c0_10 = arith.constant 0 : index
      %c0_11 = arith.constant 0 : index
      %35 = vector.load %arg5[%c0_10, %c0_11] : memref<8x128xf32, #tpu.memory_space<vmem>>, vector<8x128xf32>
      %cst_12 = arith.constant 0.000000e+00 : f32
      %36 = vector.broadcast %cst_12 : f32 to vector<8x128xf32>
      %37 = arith.select %34, %25, %36 : vector<8x128xi1>, vector<8x128xf32>
      %38 = arith.addf %35, %37 : vector<8x128xf32>
      %c0_13 = arith.constant 0 : index
      %c0_14 = arith.constant 0 : index
      %39 = vector.load %arg5[%c0_13, %c0_14] : memref<8x128xf32, #tpu.memory_space<vmem>>, vector<8x128xf32>
      tpu.vector_store %arg5[%c0_13, %c0_14], %38 {strides = array<i32>} : memref<8x128xf32, #tpu.memory_space<vmem>>, vector<8x128xf32>,
      %c0_15 = arith.constant 0 : index
      %c0_16 = arith.constant 0 : index
      %40 = vector.load %arg6[%c0_15, %c0_16] : memref<8x128xf32, #tpu.memory_space<vmem>>, vector<8x128xf32>
      %cst_17 = arith.constant 0.000000e+00 : f32
      %41 = vector.broadcast %cst_17 : f32 to vector<8x128xf32>
      %42 = arith.select %34, %28, %41 : vector<8x128xi1>, vector<8x128xf32>
      %43 = arith.addf %40, %42 : vector<8x128xf32>
      %c0_18 = arith.constant 0 : index
      %c0_19 = arith.constant 0 : index
      %44 = vector.load %arg6[%c0_18, %c0_19] : memref<8x128xf32, #tpu.memory_space<vmem>>, vector<8x128xf32>
      tpu.vector_store %arg6[%c0_18, %c0_19], %43 {strides = array<i32>} : memref<8x128xf32, #tpu.memory_space<vmem>>, vector<8x128xf32>,
      %c1_i32_20 = arith.constant 1 : i32
    } else {
    }
    %c0_i32_4 = arith.constant 0 : i32
    %13 = arith.cmpi eq, %arg1, %c0_i32_4 : i32
    %14 = arith.extui %13 : i1 to i32
    %c0_i32_5 = arith.constant 0 : i32
    %15 = arith.cmpi ne, %14, %c0_i32_5 : i32
    scf.if %15 {
      %c0 = arith.constant 0 : index
      %c0_6 = arith.constant 0 : index
      %16 = vector.load %arg5[%c0, %c0_6] : memref<8x128xf32, #tpu.memory_space<vmem>>, vector<8x128xf32>
      %c0_7 = arith.constant 0 : index
      %c0_8 = arith.constant 0 : index
      %c0_9 = arith.constant 0 : index
      %17 = vector.load %arg3[%c0_7, %c0_8, %c0_9] : memref<1x8x128xf32, #tpu.memory_space<vmem>>, vector<1x8x128xf32>
      %18 = vector.shape_cast %17 : vector<1x8x128xf32> to vector<8x128xf32>
      %19 = vector.shape_cast %16 : vector<8x128xf32> to vector<1x8x128xf32>
      tpu.vector_store %arg3[%c0_7, %c0_8, %c0_9], %19 {strides = array<i32>} : memref<1x8x128xf32, #tpu.memory_space<vmem>>, vector<1x8x128xf32>,
      %c0_10 = arith.constant 0 : index
      %c0_11 = arith.constant 0 : index
      %20 = vector.load %arg6[%c0_10, %c0_11] : memref<8x128xf32, #tpu.memory_space<vmem>>, vector<8x128xf32>
      %c0_12 = arith.constant 0 : index
      %c0_13 = arith.constant 0 : index
      %c0_14 = arith.constant 0 : index
      %21 = vector.load %arg4[%c0_12, %c0_13, %c0_14] : memref<1x8x128xf32, #tpu.memory_space<vmem>>, vector<1x8x128xf32>
      %22 = vector.shape_cast %21 : vector<1x8x128xf32> to vector<8x128xf32>
      %23 = vector.shape_cast %20 : vector<8x128xf32> to vector<1x8x128xf32>
      tpu.vector_store %arg4[%c0_12, %c0_13, %c0_14], %23 {strides = array<i32>} : memref<1x8x128xf32, #tpu.memory_space<vmem>>, vector<1x8x128xf32>,
    } else {
    }
    return
  }
  func.func @transform_0(%arg0: i32, %arg1: i32) -> (i32, i32) {
    %c1_i32 = arith.constant 1 : i32
    %0 = arith.muli %arg0, %c1_i32 : i32
    %1 = arith.addi %0, %arg1 : i32
    %c0_i32 = arith.constant 0 : i32
    %2 = arith.minsi %1, %c0_i32 : i32
    %c0_i32_0 = arith.constant 0 : i32
    %c0_i32_1 = arith.constant 0 : i32
    return %2, %c0_i32_0 : i32, i32
  }
  func.func @transform_1(%arg0: i32, %arg1: i32) -> (i32, i32, i32) {
    %c0_i32 = arith.constant 0 : i32
    %c0_i32_0 = arith.constant 0 : i32
    %c0_i32_1 = arith.constant 0 : i32
    return %arg0, %c0_i32, %c0_i32_0 : i32, i32, i32
  }
  func.func @transform_2(%arg0: i32, %arg1: i32) -> (i32, i32, i32) {
    %c0_i32 = arith.constant 0 : i32
    %c0_i32_0 = arith.constant 0 : i32
    %c0_i32_1 = arith.constant 0 : i32
    return %arg0, %c0_i32, %c0_i32_0 : i32, i32, i32
  }
}

</mosaic_0001>

<bundles_post_ra>
// kernel: tpu_custom_call.1
= control target key start
LH: loop header
LB: loop body
LE: loop exit
PB: predicated region body
PF: predicated region fallthrough
CT: control target
= control target key end

     0   :  { %8 = vsyncpa [#allocation5], 0  ;;  %s476_s0 = inlined_call_operand.hbm [shape: f32[8,128], index: 0, kind: input, shape index: {}]   ;;  %s477_s1 = inlined_call_operand.hbm [shape: f32[1,8,128], index: 1, kind: output, shape index: {0}]   ;;  %s478_s2 = inlined_call_operand.hbm [shape: f32[1,8,128], index: 2, kind: output, shape index: {1}]  }
   0x1   :  { %9 = vsyncpa [#allocation6], 0 }
   0x2   :  { %10 = vsyncpa [#allocation9], 0  ;;  %s415_s9 = smov [#allocation4]  }
   0x3   :  { %s22_s10 = sshll.u32 %s415_s9, 4  ;;  %s23_s10 = int_to_ptr.vmem [resolvable:$true] %s22_s10 }
   0x4   :  { %s357_s11 = scalar_lea.vmem %s23_s10, 128  ;;  %p362_p1 = scmp.lt.s32.totalorder %s23_s10, %s23_s10 }
   0x5   :  { %p358_p0 = scmp.ne.s32.totalorder %s23_s10, %s357_s11  ;;  %p363_p2 = scmp.lt.s32.totalorder %s357_s11, %s357_s11 }
   0x7   :  { %p364_p3 = por %p363_p2, %p362_p1 }
   0x9   :  { %p365_p4 = pnand %p364_p3, %p358_p0 }
   0xb   :  { %368 = shalt.err (!%p365_p4)
}
   0xc   :  { %25 = dma.hbm_to_vmem [thread:$0]  %s476_s0, 128, %s23_s10, [#allocation5]  }
   0xd   :  { %409 = dma.done.wait [#allocation5], 128  }
   0xe   :  { %410 = vsyncadd [#allocation5], 4294967168  ;;  %v161_v0 = vlaneseq  ;;  %v167_v5 = vld [vmem:[#allocation4] sm:$0xff]  ;;  %s416_s14 = smov [#allocation7]  }
   0xf   :  { %s299_s15 = sshll.u32 %s416_s14, 4  ;;  %v168_v6 = vmul.f32 %v167_v5, %v167_v5  ;;  %v444_v7 = vmul.f32 6.2831855, %v167_v5  ;;  %s300_s15 = int_to_ptr.vmem [resolvable:$true] %s299_s15 }
  0x10   :  { %v162_v1 = vshrl.u32 %v161_v0, 7  ;;  %v165_v2 = vand.u32 127, %v161_v0  ;;  %s369_s0 = scalar_lea.vmem %s300_s15, 128  ;;  %p374_p6 = scmp.lt.s32.totalorder %s300_s15, %s300_s15 }
  0x11   :  { %v173_v8 = vand.u32 2139095040, %v444_v7  ;;  %v170_v11 = vand.u32 2147483647, %v444_v7  ;;  %p370_p5 = scmp.ne.s32.totalorder %s300_s15, %s369_s0  ;;  %p375_p7 = scmp.lt.s32.totalorder %s369_s0, %s369_s0 }
  0x12   :  { %v163_v3 = vmul.u32 128, %v162_v1 }
  0x13   :  { %v174_v10 = vshrl.u32 %v173_v8, 23  ;;  %p376_p8 = por %p375_p7, %p374_p6 }
  0x14   :  { %v442_v4 = vadd.s32 %v165_v2, %v163_v3 }
  0x15   :  { %p377_p9 = pnand %p376_p8, %p370_p5 }
  0x16   :  { %vm277_vm0 = vcmp.lt.s32.totalorder %v442_v4, 128 }
  0x17   :  { %v279_v9 = vsel %vm277_vm0, %v168_v6, 0.0 }
  0x18   :  { %290 = vst [vmem:[#allocation7] sm:$0xff] %v279_v9 }
  0x19   :  { %380 = shalt.err (!%p377_p9)
}
  0x1a   :  { %302 = dma.vmem_to_hbm [thread:$0]  %s300_s15, 128, %s477_s1, [#allocation6]   ;;  %v328_v12 = vadd.s32 4294967169, %v174_v10  ;;  %v177_v14 = vand.u32 8388607, %v170_v11  ;;  %vm172_vm8 = vcmp.lt.s32.totalorder %v444_v7, 0  ;;  %vm262_vm13 = vweird.f32 %v444_v7 }
  0x1b   :  { %v417_v20 = vmov 683565275   ;;  %v418_v22 = vmov 2475754826   ;;  %v419_v24 = vmov 2131351028  }
  0x1c   :  { %v180_v13 = vadd.s32 1, %v328_v12  ;;  %v178_v18 = vor.u32 8388608, %v177_v14  ;;  %v420_v26 = vmov 2102212464   ;;  %v421_v28 = vmov 920167782  }
  0x1d   :  { %v422_v35 = vmov 1326507024   ;;  %vm171_vm9 = vcmp.le.f32.partialorder %v170_v11, 0.7853982  ;;  %s423_s1 = smov [#allocation8]  }
  0x1e   :  { %vm181_vm1 = vcmp.gt.s32.totalorder %v180_v13, 0  ;;  %v218_v37 = vshll.u32 %v178_v18, 8  ;;  %s309_s18 = sshll.u32 %s423_s1, 4  ;;  %s310_s18 = int_to_ptr.vmem [resolvable:$true] %s309_s18 }
  0x1f   :  { %v182_v15 = vsel %vm181_vm1, %v180_v13, 0  ;;  %s389_s19 = scalar_lea.vmem %s310_s18, 128  ;;  %p394_p11 = scmp.lt.s32.totalorder %s310_s18, %s310_s18 }
  0x20   :  { %v184_v16 = vand.u32 31, %v182_v15  ;;  %v183_v17 = vshrl.u32 %v182_v15, 5  ;;  %p390_p10 = scmp.ne.s32.totalorder %s310_s18, %s389_s19  ;;  %p395_p12 = scmp.lt.s32.totalorder %s389_s19, %s389_s19 }
  0x22   :  { %v185_v19 = vsub.s32 32, %v184_v16  ;;  %v187_v21 = vshll.u32 %v417_v20, %v184_v16  ;;  %v190_v23 = vshll.u32 %v418_v22, %v184_v16  ;;  %v193_v25 = vshll.u32 %v419_v24, %v184_v16  ;;  %p396_p13 = por %p395_p12, %p394_p11 }
  0x23   :  { %v196_v27 = vshll.u32 %v420_v26, %v184_v16  ;;  %v199_v29 = vshll.u32 %v421_v28, %v184_v16  ;;  %vm202_vm2 = vcmp.lt.s32.totalorder %v183_v17, 1  ;;  %vm205_vm3 = vcmp.lt.s32.totalorder %v183_v17, 4 }
  0x24   :  { %v186_v30 = vshrl.u32 %v417_v20, %v185_v19  ;;  %v188_v31 = vshrl.u32 %v418_v22, %v185_v19  ;;  %v191_v32 = vshrl.u32 %v419_v24, %v185_v19  ;;  %v194_v33 = vshrl.u32 %v420_v26, %v185_v19  ;;  %p397_p0 = pnand %p396_p13, %p390_p10 }
  0x25   :  { %v197_v34 = vshrl.u32 %v421_v28, %v185_v19  ;;  %v200_v36 = vshrl.u32 %v422_v35, %v185_v19  ;;  %vm203_vm4 = vcmp.lt.s32.totalorder %v183_v17, 2  ;;  %vm204_vm5 = vcmp.lt.s32.totalorder %v183_v17, 3 }
  0x26   :  { %v189_v38 = vor.u32 %v188_v31, %v187_v21  ;;  %v192_v39 = vor.u32 %v191_v32, %v190_v23  ;;  %v195_v40 = vor.u32 %v194_v33, %v193_v25 }
  0x27   :  { %v198_v41 = vor.u32 %v197_v34, %v196_v27  ;;  %v201_v42 = vor.u32 %v200_v36, %v199_v29 }
  0x28   :  { %v206_v43 = vsel %vm202_vm2, %v186_v30, %v189_v38  ;;  %v207_v44 = vsel %vm205_vm3, %v195_v40, 2102212464  ;;  %v210_v45 = vsel %vm202_vm2, %v189_v38, %v192_v39  ;;  %v214_v46 = vsel %vm202_vm2, %v192_v39, %v195_v40 }
  0x29   :  { %v208_v47 = vsel %vm204_vm5, %v192_v39, %v207_v44  ;;  %v211_v48 = vsel %vm205_vm3, %v198_v41, 920167782  ;;  %v215_v49 = vsel %vm205_vm3, %v201_v42, 1326507024 }
  0x2a   :  { %v212_v50 = vsel %vm204_vm5, %v195_v40, %v211_v48  ;;  %v216_v51 = vsel %vm204_vm5, %v198_v41, %v215_v49  ;;  %v209_v52 = vsel %vm203_vm4, %v206_v43, %v208_v47 }
  0x2b   :  { %v213_v53 = vsel %vm203_vm4, %v210_v45, %v212_v50  ;;  %v217_v54 = vsel %vm203_vm4, %v214_v46, %v216_v51  ;;  %v225_v59 = vmul.u32 %v218_v37, %v209_v52 }
  0x2c   :  { %v456_v55 = vmul.u32.u64.low %v218_v37, %v217_v54  ;;  %v457_v56 = vmul.u32.u64.high %v218_v37, %v217_v54, %v456_v55  ;;  %v459_v57 = vmul.u32.u64.low %v218_v37, %v213_v53  ;;  %v460_v58 = vmul.u32.u64.high %v218_v37, %v213_v53, %v459_v57 }
  0x2e   :  { %vm227_vm6 = vc.u32 %v457_v56, %v459_v57  ;;  %v228_v60 = vadd.s32 1, %v460_v58  ;;  %v226_v9 = vadd.s32 %v459_v57, %v457_v56 }
  0x30   :  { %v229_v61 = vsel %vm227_vm6, %v228_v60, %v460_v58 }
  0x31   :  { %v230_v62 = vadd.s32 %v229_v61, %v225_v59 }
  0x33   :  { %v231_v63 = vadd.s32 536870912, %v230_v62 }
  0x35   :  { %v232_v0 = vshrl.u32 %v231_v63, 30 }
  0x37   :  { %v233_v1 = vshll.u32 %v232_v0, 30  ;;  %v256_v25 = vsub.s32 4, %v232_v0 }
  0x39   :  { %v234_v2 = vsub.s32 %v230_v62, %v233_v1  ;;  %v257_v27 = vsel %vm172_vm8, %v256_v25, %v232_v0 }
  0x3a   :  { %v259_v28 = vsel %vm171_vm9, 0, %v257_v27 }
  0x3b   :  { %v236_v3 = vsub.s32 0, %v234_v2  ;;  %v263_v29 = vand.u32 3, %v259_v28 }
  0x3d   :  { %v329_v5 = vmin.u32 %v236_v3, %v234_v2  ;;  %vm268_vm10 = vcmp.eq.s32.totalorder %v263_v29, 2  ;;  %vm265_vm11 = vcmp.eq.s32.totalorder %v263_v29, 0  ;;  %vm264_vm12 = vcmp.lt.s32.totalorder %v263_v29, 2 }
  0x3f   :  { %v238_v6 = vclz %v329_v5 }
  0x41   :  { %v330_v8 = vadd.s32 4294967294, %v238_v6 }
  0x43   :  { %vm331_vm7 = vcmp.lt.s32.totalorder %v330_v8, 0 }
  0x44   :  { %v241_v10 = vsel %vm331_vm7, 0, %v330_v8 }
  0x45   :  { %v242_v12 = vsub.s32 32, %v241_v10  ;;  %v243_v13 = vshll.u32 %v234_v2, %v241_v10  ;;  %v246_v14 = vsub.s32 4294967266, %v241_v10 }
  0x47   :  { %v244_v15 = vshrl.u32 %v226_v9, %v242_v12  ;;  %v247_v16 = vadd.s32 127, %v246_v14 }
  0x49   :  { %v245_v17 = vor.u32 %v244_v15, %v243_v13  ;;  %v248_v18 = vshll.u32 %v247_v16, 23 }
  0x4b   :  { %v249_v19 = vor.u32 4788187, %v248_v18  ;;  %v252_v20 = vcvt.s32.f32 %v245_v17 }
  0x4d   :  { %v250_v21 = vand.u32 2147483647, %v249_v19 }
  0x4f   :  { %v253_v22 = vmul.f32 %v252_v20, %v250_v21 }
  0x51   :  { %v254_v23 = vxor.u32 2147483648, %v253_v22 }
  0x53   :  { %v255_v24 = vsel %vm172_vm8, %v254_v23, %v253_v22 }
  0x54   :  { %v258_v26 = vsel %vm171_vm9, %v444_v7, %v255_v24 }
  0x55   :  { %345 = vcosq.f32 %v258_v26 }
  0x56   :  { %347 = vsinq.f32 %v258_v26 }
  0x62   :  { %v346_v30 = vpop.eup %345 }
  0x63   :  { %v348_v31 = vpop.eup %347  ;;  %v269_v32 = vxor.u32 2147483648, %v346_v30 }
  0x64   :  { %v266_v33 = vxor.u32 2147483648, %v348_v31 }
  0x65   :  { %v270_v11 = vsel %vm268_vm10, %v269_v32, %v348_v31 }
  0x66   :  { %v267_v34 = vsel %vm265_vm11, %v346_v30, %v266_v33 }
  0x67   :  { %v271_v35 = vsel %vm264_vm12, %v267_v34, %v270_v11 }
  0x68   :  { %v272_v36 = vsel %vm262_vm13, nan, %v271_v35 }
  0x69   :  { %v283_v37 = vsel %vm277_vm0, %v272_v36, 0.0 }
  0x6a   :  { %292 = vst [vmem:[#allocation8] sm:$0xff] %v283_v37 }
  0x6b   :  { %400 = shalt.err (!%p397_p0)
}
  0x6c   :  { %312 = dma.vmem_to_hbm [thread:$0]  %s310_s18, 128, %s478_s2, [#allocation9]  }
  0x6d   :  { %411 = dma.done.wait [#allocation6], 128  }
  0x6e   :  { %412 = vsyncadd [#allocation6], 4294967168 }
  0x6f   :  { %413 = dma.done.wait [#allocation9], 128  }
  0x70   :  { %414 = vsyncadd [#allocation9], 4294967168 }
  0x71   :  { %319 = vsyncpa [#allocation5], 1 }
  0x72   :  { %320 = vsyncpa [#allocation6], 1 }
  0x73   :  { %321 = vsyncpa [#allocation9], 1 }

</bundles_post_ra>
